<compile_context>
chip_gen: v6e
topology: v6e:2x2x1
jax: 0.10.0
libtpu: 0.0.40
codegen_flags: <defaults>
</compile_context>

<pallas_src>
import jax
import jax.numpy as jnp
from jax.experimental import pallas as pl
from jax.experimental.pallas import tpu as pltpu

# Conservative on-chip budget used for tile decisions: fits v7x's 64 MiB
# physical VMEM (32 MiB scoped default) with headroom; v5e/v6e have 128 MiB.
_VMEM_BUDGET = 40 * 1024 * 1024


def _matching_head_kernel_resident(x_ref, wd_ref, bd_ref, wf_ref, bf_ref, o_ref):
    # w_dense is VMEM-resident (constant index_map -> fetched once): one MXU
    # matmul per batch tile, f32 accumulation, then the epilogue.
    acc = jnp.dot(x_ref[...], wd_ref[...], preferred_element_type=jnp.float32)
    pooled = jnp.tanh(acc + bd_ref[...].astype(jnp.float32))
    # fc (H -> 1) on VPU/XLU: elementwise multiply + lane reduce, all f32.
    out = jnp.sum(pooled * wf_ref[...].astype(jnp.float32),
                  axis=-1, keepdims=True)
    o_ref[...] = (out + bf_ref[0, 0]).astype(o_ref.dtype)


def _matching_head_kernel_streamed(x_ref, wd_ref, bd_ref, wf_ref, bf_ref, o_ref,
                                   acc_ref):
    k = pl.program_id(1)

    # Pooler matmul partial product for this K tile (MXU, f32 accumulation).
    partial = jnp.dot(x_ref[...], wd_ref[...],
                      preferred_element_type=jnp.float32)

    @pl.when(k == 0)
    def _init():
        # Direct assign on the first K step: no zero-init store + reload.
        acc_ref[...] = partial

    @pl.when(k > 0)
    def _accum():
        acc_ref[...] += partial

    @pl.when(k == pl.num_programs(1) - 1)
    def _finalize():
        pooled = jnp.tanh(acc_ref[...] + bd_ref[...].astype(jnp.float32))
        out = jnp.sum(pooled * wf_ref[...].astype(jnp.float32),
                      axis=-1, keepdims=True)
        o_ref[...] = (out + bf_ref[0, 0]).astype(o_ref.dtype)


def _pick_tile(dim, preferred, align):
    """Largest multiple of `align` <= preferred that divides `dim`; else full dim."""
    if dim % align != 0 or dim <= preferred:
        return dim
    t = (min(preferred, dim) // align) * align
    while t >= align:
        if dim % t == 0:
            return t
        t -= align
    return dim


def matching_head(x, w_dense, b_dense, w_fc, b_fc, *,
                  block_b=256, block_k=512, compute_dtype=jnp.bfloat16):
    """x: (B, S, H); w_dense: (H, H) in->out; b_dense: (H,) or (1, H);
    w_fc: (H, 1) in->out; b_fc: scalar-like.  Returns (B, 1) in x.dtype.

    compute_dtype: dtype fed to the MXU (default bf16; accumulation/epilogue
    stay f32).  Pass None to keep the caller's dtype end-to-end.
    """
    B, S, H = x.shape
    out_dtype = x.dtype
    cdtype = jnp.dtype(compute_dtype) if compute_dtype is not None else jnp.dtype(x.dtype)

    # Only the first (CLS) token is used — slice before the pallas_call so the
    # kernel never DMAs the other S-1 sequence positions.
    x0 = x[:, 0, :].astype(cdtype)                      # (B, H)
    wd = w_dense.astype(cdtype)                         # (H, H)
    bd = jnp.reshape(b_dense, (1, H))                   # (1, H)
    wf = jnp.reshape(w_fc, (1, H))                      # lane-major for VPU reduce
    bf = jnp.reshape(b_fc, (1, 1)).astype(jnp.float32)  # SMEM scalar

    # Batch tile: pad small batches to the sublane count (8); tile at block_b
    # for large batches.
    if B >= block_b:
        tB = block_b
    else:
        tB = max(8, ((B + 7) // 8) * 8)
    B_pad = ((B + tB - 1) // tB) * tB
    if B_pad != B:
        x0 = jnp.pad(x0, ((0, B_pad - B), (0, 0)))
    n_btiles = B_pad // tB

    xbytes = cdtype.itemsize
    wbytes = cdtype.itemsize
    const_bytes = 2 * (2 * H * 4) + 1024      # b_dense + w_fc (double-buffered)
    out_bytes = 2 * tB * 4

    # --- choose variant ------------------------------------------------------
    resident_bytes = (2 * tB * H * xbytes     # x0 tile (double-buffered)
                      + 2 * H * H * wbytes    # full resident weight (2 buffers)
                      + const_bytes + out_bytes)
    use_resident = (n_btiles > 1) and (resident_bytes <= _VMEM_BUDGET)

    if use_resident:
        vmem_bytes = resident_bytes
        grid = (n_btiles,)
        in_specs = [
            pl.BlockSpec((tB, H), lambda i: (i, 0)),       # CLS-token batch tile
            pl.BlockSpec((H, H), lambda i: (0, 0)),        # resident weight (DMA'd once)
            pl.BlockSpec((1, H), lambda i: (0, 0)),        # b_dense
            pl.BlockSpec((1, H), lambda i: (0, 0)),        # w_fc (row)
            pl.BlockSpec(memory_space=pltpu.MemorySpace.SMEM),  # b_fc scalar
        ]
        out_specs = pl.BlockSpec((tB, 1), lambda i: (i, 0))
        scratch_shapes = []
        kernel = _matching_head_kernel_resident
        dim_sem = ("parallel",)
        weight_hbm_bytes = H * H * wbytes                  # streamed exactly once
    else:
        # Reduction (K) tile over the hidden dim: multiple of 128 dividing H,
        # else the full dim; shrink if needed to honour the VMEM budget.
        tK = _pick_tile(H, block_k, 128)

        def _streamed_bytes(tk):
            return (2 * tB * tk * xbytes                   # x0 tiles
                    + 2 * tk * H * wbytes                  # w_dense K-slabs
                    + tB * H * 4                           # f32 accumulator
                    + const_bytes + out_bytes)

        while H % 128 == 0 and tK > 128 and _streamed_bytes(tK) > _VMEM_BUDGET:
            new_tK = _pick_tile(H, tK // 2, 128)
            if new_tK >= tK:
                break
            tK = new_tK

        vmem_bytes = _streamed_bytes(tK)
        grid = (n_btiles, H // tK)
        in_specs = [
            pl.BlockSpec((tB, tK), lambda i, k: (i, k)),   # CLS-token tile
            pl.BlockSpec((tK, H), lambda i, k: (k, 0)),    # w_dense K-slab
            pl.BlockSpec((1, H), lambda i, k: (0, 0)),     # b_dense
            pl.BlockSpec((1, H), lambda i, k: (0, 0)),     # w_fc (row)
            pl.BlockSpec(memory_space=pltpu.MemorySpace.SMEM),  # b_fc scalar
        ]
        out_specs = pl.BlockSpec((tB, 1), lambda i, k: (i, 0))
        scratch_shapes = [pltpu.VMEM((tB, H), jnp.float32)]
        kernel = _matching_head_kernel_streamed
        dim_sem = ("parallel", "arbitrary")
        weight_hbm_bytes = n_btiles * H * H * wbytes       # re-streamed per batch tile

    # Explicit VMEM budget: above v5e's 16 MiB scoped default, under v7x's
    # 64 MiB physical.
    vmem_limit = int(min(max(vmem_bytes + (8 << 20), 32 << 20), 56 << 20))

    cost = pl.CostEstimate(
        flops=2 * B_pad * H * H + 2 * B_pad * H,
        transcendentals=B_pad * H,
        bytes_accessed=weight_hbm_bytes + B_pad * H * xbytes + B_pad * 4 + 3 * H * 4,
    )

    out = pl.pallas_call(
        kernel,
        out_shape=jax.ShapeDtypeStruct((B_pad, 1), out_dtype),
        grid_spec=pltpu.PrefetchScalarGridSpec(
            num_scalar_prefetch=0,
            grid=grid,
            in_specs=in_specs,
            out_specs=out_specs,
            scratch_shapes=scratch_shapes,
        ),
        compiler_params=pltpu.CompilerParams(
            dimension_semantics=dim_sem,
            vmem_limit_bytes=vmem_limit),
        cost_estimate=cost,
    )(x0, wd, bd, wf, bf)

    return out[:B]


def init_params(key, hidden_size, dtype=jnp.float32):
    """Deterministic synthetic init mimicking nn.Linear's U(-1/sqrt(fan_in), ...)."""
    k1, k2, k3, k4 = jax.random.split(key, 4)
    bound = 1.0 / (hidden_size ** 0.5)
    # Stored as (in_features, out_features) — transpose of PyTorch layout.
    w_dense = jax.random.uniform(k1, (hidden_size, hidden_size), dtype,
                                 minval=-bound, maxval=bound)
    b_dense = jax.random.uniform(k2, (1, hidden_size), dtype,
                                 minval=-bound, maxval=bound)
    w_fc = jax.random.uniform(k3, (hidden_size, 1), dtype,
                              minval=-bound, maxval=bound)
    b_fc = jax.random.uniform(k4, (1, 1), dtype,
                              minval=-bound, maxval=bound)
    return w_dense, b_dense, w_fc, b_fc


def _reference(x, w_dense, b_dense, w_fc, b_fc):
    H = x.shape[-1]
    pooled = jnp.tanh(x[:, 0, :] @ w_dense + jnp.reshape(b_dense, (1, H)))
    return pooled @ jnp.reshape(w_fc, (H, 1)) + jnp.reshape(b_fc, (1, 1))


if __name__ == "__main__":
    key = jax.random.PRNGKey(0)
    kx, kp, kx2, kp2 = jax.random.split(key, 4)

    # --- small-shape check (B=2, S=8, H=32) — streamed path, single tile ---
    B, S, H = 2, 8, 32
    x = jax.random.normal(kx, (B, S, H), jnp.float32)
    w_dense, b_dense, w_fc, b_fc = init_params(kp, H)
    ref = _reference(x, w_dense, b_dense, w_fc, b_fc)

    # exact-dtype path (f32 end to end)
    out_f32 = jax.block_until_ready(
        matching_head(x, w_dense, b_dense, w_fc, b_fc, compute_dtype=None))
    assert out_f32.shape == (B, 1)
    assert jnp.allclose(out_f32, ref, atol=1e-5, rtol=1e-5)

    # default perf path: bf16 MXU inputs, f32 accumulation/epilogue
    out_bf16 = jax.block_until_ready(
        matching_head(x, w_dense, b_dense, w_fc, b_fc))
    assert out_bf16.shape == (B, 1)
    assert jnp.allclose(out_bf16, ref, atol=3e-2, rtol=3e-2)

    # --- multi-batch-tile check — exercises the weight-resident variant ---
    B2, S2, H2 = 320, 4, 128
    x2 = jax.random.normal(kx2, (B2, S2, H2), jnp.float32)
    w_dense2, b_dense2, w_fc2, b_fc2 = init_params(kp2, H2)
    ref2 = _reference(x2, w_dense2, b_dense2, w_fc2, b_fc2)
    out2 = jax.block_until_ready(
        matching_head(x2, w_dense2, b_dense2, w_fc2, b_fc2, compute_dtype=None))
    assert out2.shape == (B2, 1)
    assert jnp.allclose(out2, ref2, atol=1e-4, rtol=1e-4)

    print("KERNEL_OK")
</pallas_src>

<mosaic_0001>
module attributes {stable_mosaic.version = 11 : i64} {
  func.func @_matching_head_kernel_streamed(%arg0: i32, %arg1: i32, %arg2: memref<8x32xf32, #tpu.memory_space<vmem>>, %arg3: memref<32x32xf32, #tpu.memory_space<vmem>>, %arg4: memref<1x32xf32, #tpu.memory_space<vmem>>, %arg5: memref<1x32xf32, #tpu.memory_space<vmem>>, %arg6: memref<1x1xf32, #tpu.memory_space<smem>>, %arg7: memref<8x1xf32, #tpu.memory_space<vmem>>, %arg8: memref<8x32xf32, #tpu.memory_space<vmem>>) attributes {dimension_semantics = [#tpu.dimension_semantics<parallel>, #tpu.dimension_semantics<arbitrary>], iteration_bounds = array<i64: 1, 1>, scalar_prefetch = 0 : i64, scratch_operands = 1 : i64, tpu.core_type = #tpu.core_type<tc>, window_params = [{transform_indices = @transform_0, window_bounds = array<i64: 8, 32>}, {transform_indices = @transform_1, window_bounds = array<i64: 32, 32>}, {pipeline_mode = #tpu.pipeline_mode<synchronous>, transform_indices = @transform_2, window_bounds = array<i64: 1, 32>}, {pipeline_mode = #tpu.pipeline_mode<synchronous>, transform_indices = @transform_3, window_bounds = array<i64: 1, 32>}, {transform_indices = @transform_4, window_bounds = array<i64: 1, 1>}, {transform_indices = @transform_5, window_bounds = array<i64: 8, 1>}]} {
    %c0 = arith.constant 0 : index
    %c0_0 = arith.constant 0 : index
    %0 = vector.load %arg2[%c0, %c0_0] : memref<8x32xf32, #tpu.memory_space<vmem>>, vector<8x32xf32>
    %c0_1 = arith.constant 0 : index
    %c0_2 = arith.constant 0 : index
    %1 = vector.load %arg3[%c0_1, %c0_2] : memref<32x32xf32, #tpu.memory_space<vmem>>, vector<32x32xf32>
    %cst = arith.constant dense<0.000000e+00> : vector<8x32xf32>
    %2 = tpu.matmul %0, %1, %cst {dimension_numbers = #tpu.dot_dimension_numbers<[1], [0], [0], [1], [0, 0, 1, 1], [], []>} : vector<8x32xf32>, vector<32x32xf32>, vector<8x32xf32> -> vector<8x32xf32>
    %c0_i32 = arith.constant 0 : i32
    %3 = arith.cmpi eq, %arg1, %c0_i32 : i32
    %4 = arith.extui %3 : i1 to i32
    %c0_i32_3 = arith.constant 0 : i32
    %5 = arith.cmpi ne, %4, %c0_i32_3 : i32
    scf.if %5 {
      %c0_8 = arith.constant 0 : index
      %c0_9 = arith.constant 0 : index
      %12 = vector.load %arg8[%c0_8, %c0_9] : memref<8x32xf32, #tpu.memory_space<vmem>>, vector<8x32xf32>
      tpu.vector_store %arg8[%c0_8, %c0_9], %2 {strides = array<i32>} : memref<8x32xf32, #tpu.memory_space<vmem>>, vector<8x32xf32>,
    } else {
    }
    %c0_i32_4 = arith.constant 0 : i32
    %6 = arith.cmpi sgt, %arg1, %c0_i32_4 : i32
    %7 = arith.extui %6 : i1 to i32
    %c0_i32_5 = arith.constant 0 : i32
    %8 = arith.cmpi ne, %7, %c0_i32_5 : i32
    scf.if %8 {
      %c0_8 = arith.constant 0 : index
      %c0_9 = arith.constant 0 : index
      %12 = vector.load %arg8[%c0_8, %c0_9] : memref<8x32xf32, #tpu.memory_space<vmem>>, vector<8x32xf32>
      %13 = arith.addf %12, %2 : vector<8x32xf32>
      %c0_10 = arith.constant 0 : index
      %c0_11 = arith.constant 0 : index
      %14 = vector.load %arg8[%c0_10, %c0_11] : memref<8x32xf32, #tpu.memory_space<vmem>>, vector<8x32xf32>
      tpu.vector_store %arg8[%c0_10, %c0_11], %13 {strides = array<i32>} : memref<8x32xf32, #tpu.memory_space<vmem>>, vector<8x32xf32>,
    } else {
    }
    %c0_i32_6 = arith.constant 0 : i32
    %9 = arith.cmpi eq, %arg1, %c0_i32_6 : i32
    %10 = arith.extui %9 : i1 to i32
    %c0_i32_7 = arith.constant 0 : i32
    %11 = arith.cmpi ne, %10, %c0_i32_7 : i32
    scf.if %11 {
      %c0_8 = arith.constant 0 : index
      %c0_9 = arith.constant 0 : index
      %12 = vector.load %arg8[%c0_8, %c0_9] : memref<8x32xf32, #tpu.memory_space<vmem>>, vector<8x32xf32>
      %c0_10 = arith.constant 0 : index
      %c0_11 = arith.constant 0 : index
      %13 = vector.load %arg4[%c0_10, %c0_11] : memref<1x32xf32, #tpu.memory_space<vmem>>, vector<1x32xf32>
      %14 = vector.broadcast %13 : vector<1x32xf32> to vector<8x32xf32>
      %15 = arith.addf %12, %14 : vector<8x32xf32>
      %16 = math.tanh %15 : vector<8x32xf32>
      %c0_12 = arith.constant 0 : index
      %c0_13 = arith.constant 0 : index
      %17 = vector.load %arg5[%c0_12, %c0_13] : memref<1x32xf32, #tpu.memory_space<vmem>>, vector<1x32xf32>
      %18 = vector.broadcast %17 : vector<1x32xf32> to vector<8x32xf32>
      %19 = arith.mulf %16, %18 : vector<8x32xf32>
      %cst_14 = arith.constant dense<0.000000e+00> : vector<8xf32>
      %20 = vector.multi_reduction <add>, %19, %cst_14 [1] : vector<8x32xf32> to vector<8xf32>
      %21 = vector.shape_cast %20 : vector<8xf32> to vector<8x1xf32>
      %c0_15 = arith.constant 0 : index
      %c0_16 = arith.constant 0 : index
      %22 = memref.load %arg6[%c0_15, %c0_16] : memref<1x1xf32, #tpu.memory_space<smem>>
      %23 = vector.broadcast %22 : f32 to vector<8x1xf32>
      %24 = arith.addf %21, %23 : vector<8x1xf32>
      %c0_17 = arith.constant 0 : index
      %c0_18 = arith.constant 0 : index
      %25 = vector.load %arg7[%c0_17, %c0_18] : memref<8x1xf32, #tpu.memory_space<vmem>>, vector<8x1xf32>
      tpu.vector_store %arg7[%c0_17, %c0_18], %24 {strides = array<i32>} : memref<8x1xf32, #tpu.memory_space<vmem>>, vector<8x1xf32>,
    } else {
    }
    return
  }
  func.func @transform_0(%arg0: i32, %arg1: i32) -> (i32, i32) {
    %c0_i32 = arith.constant 0 : i32
    return %arg0, %arg1 : i32, i32
  }
  func.func @transform_1(%arg0: i32, %arg1: i32) -> (i32, i32) {
    %c0_i32 = arith.constant 0 : i32
    %c0_i32_0 = arith.constant 0 : i32
    return %arg1, %c0_i32 : i32, i32
  }
  func.func @transform_2(%arg0: i32, %arg1: i32) -> (i32, i32) {
    %c0_i32 = arith.constant 0 : i32
    %c0_i32_0 = arith.constant 0 : i32
    %c0_i32_1 = arith.constant 0 : i32
    return %c0_i32, %c0_i32_0 : i32, i32
  }
  func.func @transform_3(%arg0: i32, %arg1: i32) -> (i32, i32) {
    %c0_i32 = arith.constant 0 : i32
    %c0_i32_0 = arith.constant 0 : i32
    %c0_i32_1 = arith.constant 0 : i32
    return %c0_i32, %c0_i32_0 : i32, i32
  }
  func.func @transform_4(%arg0: i32, %arg1: i32) -> (i32, i32) {
    %c0_i32 = arith.constant 0 : i32
    %c0_i32_0 = arith.constant 0 : i32
    %c0_i32_1 = arith.constant 0 : i32
    return %c0_i32, %c0_i32_0 : i32, i32
  }
  func.func @transform_5(%arg0: i32, %arg1: i32) -> (i32, i32) {
    %c0_i32 = arith.constant 0 : i32
    %c0_i32_0 = arith.constant 0 : i32
    return %arg0, %c0_i32 : i32, i32
  }
}

</mosaic_0001>

<bundles_post_ra>
// kernel: tpu_custom_call.1
= control target key start
LH: loop header
LB: loop body
LE: loop exit
PB: predicated region body
PF: predicated region fallthrough
CT: control target
= control target key end

     0   :  { %11 = vsyncpa [#allocation5], 0  ;;  %s298_s0 = inlined_call_operand.hbm [shape: f32[8,32], index: 0, kind: input, shape index: {}]   ;;  %s299_s1 = inlined_call_operand.hbm [shape: f32[32,32], index: 1, kind: input, shape index: {}]   ;;  %s300_s2 = inlined_call_operand.vmem [shape: f32[1,32], index: 2, kind: input, shape index: {}]   ;;  %s301_s3 = inlined_call_operand.vmem [shape: f32[1,32], index: 3, kind: input, shape index: {}]   ;;  %s302_s4 = inlined_call_operand.<no memory space> [shape: f32[1,1], index: 4, kind: input, shape index: {}]   ;;  %s303_s5 = inlined_call_operand.vmem [shape: f32[8,1], index: 5, kind: output, shape index: {}]  }
   0x1   :  { %12 = vsyncpa [#allocation7], 0  ;;  %s244_s18 = smov [#allocation4]   ;;  %s245_s20 = smov [#allocation6]  }
   0x2   :  { %s19_s19 = sshll.u32 %s244_s18, 4  ;;  %s28_s21 = sshll.u32 %s245_s20, 4  ;;  %s20_s19 = int_to_ptr.vmem [resolvable:$true] %s19_s19  ;;  %s29_s21 = int_to_ptr.vmem [resolvable:$true] %s28_s21 }
   0x3   :  { %s208_s22 = scalar_lea.vmem %s20_s19, 128  ;;  %p213_p1 = scmp.lt.s32.totalorder %s20_s19, %s20_s19 }
   0x4   :  { %p209_p0 = scmp.ne.s32.totalorder %s20_s19, %s208_s22  ;;  %p214_p2 = scmp.lt.s32.totalorder %s208_s22, %s208_s22 }
   0x6   :  { %p215_p3 = por %p214_p2, %p213_p1 }
   0x8   :  { %p216_p4 = pnand %p215_p3, %p209_p0 }
   0xa   :  { %219 = shalt.err (!%p216_p4)
}
   0xb   :  { %22 = dma.hbm_to_vmem [thread:$0]  %s298_s0, 128, %s20_s19, [#allocation5]  }
   0xc   :  { %s228_s25 = scalar_lea.vmem %s29_s21, 512  ;;  %p233_p6 = scmp.lt.s32.totalorder %s29_s21, %s29_s21 }
   0xd   :  { %p229_p5 = scmp.ne.s32.totalorder %s29_s21, %s228_s25  ;;  %p234_p7 = scmp.lt.s32.totalorder %s228_s25, %s228_s25 }
   0xf   :  { %p235_p8 = por %p234_p7, %p233_p6 }
  0x11   :  { %p236_p9 = pnand %p235_p8, %p229_p5 }
  0x13   :  { %239 = shalt.err (!%p236_p9)
}
  0x14   :  { %s246_s26 = smov 128   ;;  %s247_s27 = smov 8  }
  0x15   :  { %34 = dma.hbm_to_vmem [thread:$0]  %s299_s1, 512, %s29_s21, [#allocation7], %s246_s26, %s246_s26, %s247_s27  }
  0x16   :  { %240 = dma.done.wait [#allocation5], 128  }
  0x17   :  { %241 = vsyncadd [#allocation5], 4294967168 }
  0x18   :  { %242 = dma.done.wait [#allocation7], 512  }
  0x19   :  { %243 = vsyncadd [#allocation7], 4294966784  ;;  %v248_v0 = vmov 0.0   ;;  %vm249_vm0 = vmmov 0   ;;  %v51_v1 = vld [vmem:[#allocation6 + $0x18] sm:$0xff]  ;;  %v50_v2 = vld [vmem:[#allocation6 + $0x10] sm:$0xff]  ;;  %v163_v15 = vstv %s302_s4 }
  0x1a   :  { %181 = vmatprep.subr.mxu0 %v248_v0  ;;  %189 = vmatprep.mubr.msk.f32.mxu0 %vm249_vm0, %v248_v0  ;;  %v49_v3 = vld [vmem:[#allocation6 + $0x8] sm:$0xff]  ;;  %v48_v4 = vld [vmem:[#allocation6] sm:$0xff]  ;;  %v47_v5 = vld [vmem:[#allocation4] sm:$0xff]  ;;  %vm52_vm1 = vcmask 261120   ;;  %vm165_vm2 = vcmask 7168  }
  0x1b   :  { %182 = vmatpush3.msra.mxu0 %v51_v1  ;;  %v174_v8 = vld [vmem:[%s300_s2] ss:$0 sm:$0xff] }
  0x1c   :  { %183 = vmatprep.subr.mxu0 %v248_v0  ;;  %v175_v11 = vld [vmem:[%s301_s3] ss:$0 sm:$0xff] }
  0x1d   :  { %184 = vmatpush3.msra.mxu0 %v50_v2 }
  0x1e   :  { %185 = vmatprep.subr.mxu0 %v248_v0 }
  0x1f   :  { %186 = vmatpush3.msra.mxu0 %v49_v3 }
  0x20   :  { %187 = vmatprep.subr.mxu0 %v248_v0 }
  0x21   :  { %188 = vmatpush3.msra.mxu0 %v48_v4 }
  0x22   :  { %190 = vmatmul.mubr.msk.f32.vlgmr.msra.gmra.mxu0 %vm52_vm1, %v47_v5 }
  0xe2   :  { %v122_v6 = vpop.f32.mrf.mxu0 }
  0xe3   :  { %130 = vst.msk [vmem:[#allocation2] sm:$0xff] %vm52_vm1, %v122_v6 }
  0xe4   :  { %v191_v7 = vpop.f32.mrf.mxu0 }
  0xea   :  { %v141_v9 = vld [vmem:[#allocation2] sm:$0xff] }
  0xeb   :  { %v149_v10 = vadd.f32 %v174_v8, %v141_v9 }
  0xed   :  { %198 = vtanh.f32 %v149_v10 }
  0xfa   :  { %v199_v12 = vpop.eup %198 }
  0xfb   :  { %v158_v13 = vmul.f32 %v199_v12, %v175_v11 }
  0xfd   :  { %v159_v14 = vsel %vm52_vm1, %v158_v13, 0.0 }
  0xfe   :  { %160 = vadd.xlane.f32.xlu0 %v159_v14 }
 0x187   :  { %v161_v16 = vpop.xlane.xlu0 %160 }
 0x188   :  { %v164_v17 = vadd.f32 %v163_v15, %v161_v16 }
 0x18a   :  { %166 = vst.msk [vmem:[%s303_s5] sm:$0xff] %vm165_vm2, %v164_v17 }
 0x18b   :  { %171 = vsyncpa [#allocation5], 1 }
 0x18c   :  { %172 = vsyncpa [#allocation7], 1 }

</bundles_post_ra>
